<compile_context>
chip_gen: v5e
topology: v5e:2x2
jax: 0.10.0
libtpu: 0.0.40
codegen_flags: <defaults>
</compile_context>

<pallas_src>
import functools

import jax
import jax.numpy as jnp
from jax.experimental import pallas as pl
from jax.experimental.pallas import tpu as pltpu

IN_FEATURES = 20
OUT_FEATURES = 10


def _fused_mlp_kernel(x_ref, w_ref, b_ref, o_ref):
    # (TILE_B, 20) @ (20, 10) + (1, 10) -> (TILE_B, 10), f32 accumulation.
    y = jnp.dot(x_ref[...], w_ref[...], preferred_element_type=jnp.float32)
    o_ref[...] = (y + b_ref[...]).astype(o_ref.dtype)


@functools.partial(jax.jit, static_argnames=("tile_b",))
def neural_network_forward(x, w1_t, b1, w2_t, b2, *, tile_b: int = 512):
    """Pallas forward: y = (x @ w1_t + b1) @ w2_t + b2 (no tanh, see note above).

    x     : (B, 20)      float32
    w1_t  : (20, nnets)  float32   (transpose of PyTorch fc1.weight)
    b1    : (1, nnets)   float32
    w2_t  : (nnets, 10)  float32   (transpose of PyTorch fc2.weight)
    b2    : (1, 10)      float32
    returns (B, 10) float32
    """
    B = x.shape[0]

    # ---- Exact algebraic fusion of the two affine layers (tiny, done by XLA).
    w_fused = jnp.dot(w1_t, w2_t, preferred_element_type=jnp.float32)      # (20, 10)
    b_fused = jnp.dot(b1, w2_t, preferred_element_type=jnp.float32) + b2   # (1, 10)

    # ---- Batch tiling.  Second-to-last block dim must be a multiple of 8 or
    # equal the full extent; tile_b is a multiple of 8, and if B < tile_b we
    # use the full extent.  Partial trailing blocks are masked by Pallas.
    tb = tile_b if B >= tile_b else B
    grid = (pl.cdiv(B, tb),)

    cost = pl.CostEstimate(
        flops=2 * B * IN_FEATURES * OUT_FEATURES,
        transcendentals=0,
        bytes_accessed=4 * B * (IN_FEATURES + OUT_FEATURES)
        + 4 * (IN_FEATURES * OUT_FEATURES + OUT_FEATURES),
    )

    out = pl.pallas_call(
        _fused_mlp_kernel,
        out_shape=jax.ShapeDtypeStruct((B, OUT_FEATURES), jnp.float32),
        grid_spec=pltpu.PrefetchScalarGridSpec(
            num_scalar_prefetch=0,
            grid=grid,
            in_specs=[
                pl.BlockSpec((tb, IN_FEATURES), lambda i: (i, 0)),
                pl.BlockSpec((IN_FEATURES, OUT_FEATURES), lambda i: (0, 0)),
                pl.BlockSpec((1, OUT_FEATURES), lambda i: (0, 0)),
            ],
            out_specs=pl.BlockSpec((tb, OUT_FEATURES), lambda i: (i, 0)),
        ),
        compiler_params=pltpu.CompilerParams(
            dimension_semantics=("parallel",),
        ),
        cost_estimate=cost,
    )(x, w_fused, b_fused)
    return out


def init_params(key, nnets: int):
    """Deterministic init mirroring PyTorch Linear (uniform +-1/sqrt(fan_in))."""
    k1, k2, k3, k4 = jax.random.split(key, 4)
    bound1 = 1.0 / jnp.sqrt(float(IN_FEATURES))
    bound2 = 1.0 / jnp.sqrt(float(nnets))
    # PyTorch stores weight as (out, in); we keep the transposed layout.
    w1_t = jax.random.uniform(k1, (IN_FEATURES, nnets), jnp.float32, -bound1, bound1)
    b1 = jax.random.uniform(k2, (1, nnets), jnp.float32, -bound1, bound1)
    w2_t = jax.random.uniform(k3, (nnets, OUT_FEATURES), jnp.float32, -bound2, bound2)
    b2 = jax.random.uniform(k4, (1, OUT_FEATURES), jnp.float32, -bound2, bound2)
    return w1_t, b1, w2_t, b2


if __name__ == "__main__":
    key = jax.random.PRNGKey(0)
    k_x, k_p = jax.random.split(key)

    batch = 256     # small demo batch; tile_b=128 exercises a 2-step grid
    nnets = 32

    x = jax.random.normal(k_x, (batch, IN_FEATURES), jnp.float32)
    w1_t, b1, w2_t, b2 = init_params(k_p, nnets)

    y = neural_network_forward(x, w1_t, b1, w2_t, b2, tile_b=128)
    y = jax.block_until_ready(y)

    # Reference check in plain JAX (unfused two-layer form).
    y_ref = (x @ w1_t + b1) @ w2_t + b2
    assert y.shape == (batch, OUT_FEATURES)
    assert jnp.allclose(y, y_ref, atol=1e-4, rtol=1e-4), (
        float(jnp.max(jnp.abs(y - y_ref)))
    )

    print("KERNEL_OK")
</pallas_src>

<mosaic_0001>
module attributes {stable_mosaic.version = 11 : i64} {
  func.func @_fused_mlp_kernel(%arg0: i32, %arg1: memref<128x20xf32, #tpu.memory_space<vmem>>, %arg2: memref<20x10xf32, #tpu.memory_space<vmem>>, %arg3: memref<1x10xf32, #tpu.memory_space<vmem>>, %arg4: memref<128x10xf32, #tpu.memory_space<vmem>>) attributes {dimension_semantics = [#tpu.dimension_semantics<parallel>], iteration_bounds = array<i64: 2>, scalar_prefetch = 0 : i64, scratch_operands = 0 : i64, tpu.core_type = #tpu.core_type<tc>, window_params = [{transform_indices = @transform_0, window_bounds = array<i64: 128, 20>}, {pipeline_mode = #tpu.pipeline_mode<synchronous>, transform_indices = @transform_1, window_bounds = array<i64: 20, 10>}, {pipeline_mode = #tpu.pipeline_mode<synchronous>, transform_indices = @transform_2, window_bounds = array<i64: 1, 10>}, {transform_indices = @transform_3, window_bounds = array<i64: 128, 10>}]} {
    %c0 = arith.constant 0 : index
    %c0_0 = arith.constant 0 : index
    %0 = vector.load %arg1[%c0, %c0_0] : memref<128x20xf32, #tpu.memory_space<vmem>>, vector<128x20xf32>
    %c0_1 = arith.constant 0 : index
    %c0_2 = arith.constant 0 : index
    %1 = vector.load %arg2[%c0_1, %c0_2] : memref<20x10xf32, #tpu.memory_space<vmem>>, vector<20x10xf32>
    %cst = arith.constant dense<0.000000e+00> : vector<128x10xf32>
    %2 = tpu.matmul %0, %1, %cst {dimension_numbers = #tpu.dot_dimension_numbers<[1], [0], [0], [1], [0, 0, 1, 1], [], []>} : vector<128x20xf32>, vector<20x10xf32>, vector<128x10xf32> -> vector<128x10xf32>
    %c0_3 = arith.constant 0 : index
    %c0_4 = arith.constant 0 : index
    %3 = vector.load %arg3[%c0_3, %c0_4] : memref<1x10xf32, #tpu.memory_space<vmem>>, vector<1x10xf32>
    %4 = vector.broadcast %3 : vector<1x10xf32> to vector<128x10xf32>
    %5 = arith.addf %2, %4 : vector<128x10xf32>
    %c0_5 = arith.constant 0 : index
    %c0_6 = arith.constant 0 : index
    %6 = vector.load %arg4[%c0_5, %c0_6] : memref<128x10xf32, #tpu.memory_space<vmem>>, vector<128x10xf32>
    tpu.vector_store %arg4[%c0_5, %c0_6], %5 {strides = array<i32>} : memref<128x10xf32, #tpu.memory_space<vmem>>, vector<128x10xf32>,
    return
  }
  func.func @transform_0(%arg0: i32) -> (i32, i32) {
    %c0_i32 = arith.constant 0 : i32
    %c0_i32_0 = arith.constant 0 : i32
    return %arg0, %c0_i32 : i32, i32
  }
  func.func @transform_1(%arg0: i32) -> (i32, i32) {
    %c0_i32 = arith.constant 0 : i32
    %c0_i32_0 = arith.constant 0 : i32
    %c0_i32_1 = arith.constant 0 : i32
    return %c0_i32, %c0_i32_0 : i32, i32
  }
  func.func @transform_2(%arg0: i32) -> (i32, i32) {
    %c0_i32 = arith.constant 0 : i32
    %c0_i32_0 = arith.constant 0 : i32
    %c0_i32_1 = arith.constant 0 : i32
    return %c0_i32, %c0_i32_0 : i32, i32
  }
  func.func @transform_3(%arg0: i32) -> (i32, i32) {
    %c0_i32 = arith.constant 0 : i32
    %c0_i32_0 = arith.constant 0 : i32
    return %arg0, %c0_i32 : i32, i32
  }
}

</mosaic_0001>

<bundles_post_ra>
// kernel: neural_network_forward.1
= control target key start
LH: loop header
LB: loop body
LE: loop exit
PB: predicated region body
PF: predicated region fallthrough
CT: control target
= control target key end

     0   :  { %s462_s12 = smov 0   ;;  %s548_s0 = inlined_call_operand.vmem [shape: f32[256,20], index: 0, kind: input, shape index: {}]   ;;  %s549_s1 = inlined_call_operand.vmem [shape: f32[20,10], index: 1, kind: input, shape index: {}]   ;;  %s550_s2 = inlined_call_operand.vmem [shape: f32[1,10], index: 2, kind: input, shape index: {}]   ;;  %s551_s3 = inlined_call_operand.vmem [shape: f32[256,10], index: 3, kind: output, shape index: {}]  }
   0x1 LB: > { %s388_s13 = sadd.s32 4294967295, %s440_s12   ;;  %p392_p0 = scmp.ge.s32.totalorder %s440_s12, 1  ;;  %s440_s12 = sphi %s462_s12, %s13_s12  }
   0x2   : > { %p138_p1 = scmp.lt.s32.totalorder %s440_s12, 3 }
   0x4   : > { %p139_p2 = pnand %p392_p0, %p138_p1 }
   0x5   : > { %s393_s18 = sshll.u32 (!%p139_p2), %s388_s13, 4 }
   0x6   : > { %142 = sbr.rel (%p139_p2) target bundleno = 178 (0xb2), region = 32  ;;  %p163_p3 = scmp.lt.s32.totalorder (!%p139_p2), %s393_s18, 31 }
   0xb   : > { %v192_v0 = vld [vmem:[%s549_s1 + $0x10] sm:$0xf]  ;;  %vm246_vm0 = vcmask 1043456   ;;  %v191_v1 = vld [vmem:[%s549_s1 + $0x8] sm:$0xff]  ;;  %v190_v2 = vld [vmem:[%s549_s1] sm:$0xff]  ;;  %s553_s18 = smov (!%p163_p3, %s393_s18), 31 }
   0xc   : > { %417 = vmatpush.msk.msra.mxu2 %vm246_vm0, %v192_v0  ;;  %418 = vmatpush.msk.msra.mxu3 %vm246_vm0, %v192_v0  ;;  %s394_s21 = sshll.u32 %s553_s18, 3  ;;  %vm197_vm1 = vcmask 162816   ;;  %v433_v19 = vld [vmem:[%s550_s2] ss:$0 sm:$0xff]  ;;  %vm315_vm2 = vcmask 80896  }
   0xd   : > { %397 = vmatpush.msk.msra.mxu0 %vm246_vm0, %v192_v0  ;;  %416 = vmatpush.msk.msra.mxu1 %vm246_vm0, %v192_v0  ;;  %s166_s24 = scalar_lea.vmem %s548_s0, %s394_s21  ;;  %s511_s29 = scalar_lea.vmem %s551_s3, %s394_s21 }
   0xe   : > { %420 = vmatpush.msra.mxu2 %v191_v1  ;;  %421 = vmatpush.msra.mxu3 %v191_v1  ;;  %v182_v3 = vld [vmem:[%s166_s24 + $0x40] sm:$0xff]  ;;  %v183_v7 = vld [vmem:[%s166_s24 + $0x48] sm:$0xff]  ;;  %v184_v11 = vld [vmem:[%s166_s24 + $0x50] sm:$0xff] }
   0xf   : > { %264 = vmatpush.msra.mxu0 %v191_v1  ;;  %419 = vmatpush.msra.mxu1 %v191_v1  ;;  %v186_v4 = vld [vmem:[%s166_s24 + $0x60] sm:$0xff]  ;;  %v187_v8 = vld [vmem:[%s166_s24 + $0x68] sm:$0xff]  ;;  %v188_v12 = vld [vmem:[%s166_s24 + $0x70] sm:$0xff] }
  0x10   : > { %423 = vmatpush.msra.mxu2 %v190_v2  ;;  %424 = vmatpush.msra.mxu3 %v190_v2  ;;  %v174_v5 = vld [vmem:[%s166_s24] sm:$0xff]  ;;  %v175_v9 = vld [vmem:[%s166_s24 + $0x8] sm:$0xff]  ;;  %v176_v13 = vld [vmem:[%s166_s24 + $0x10] sm:$0xff] }
  0x11   : > { %265 = vmatpush.msra.mxu0 %v190_v2  ;;  %422 = vmatpush.msra.mxu1 %v190_v2  ;;  %v178_v6 = vld [vmem:[%s166_s24 + $0x20] sm:$0xff]  ;;  %v179_v10 = vld [vmem:[%s166_s24 + $0x28] sm:$0xff]  ;;  %v180_v14 = vld [vmem:[%s166_s24 + $0x30] sm:$0xff] }
  0x12   : > { %406 = vmatmul.msk.f32.vlgmr.msra.gmra.mxu2 %vm197_vm1, %v182_v3  ;;  %410 = vmatmul.msk.f32.vlgmr.msra.gmra.mxu3 %vm197_vm1, %v186_v4  ;;  %v185_v15 = vld [vmem:[%s166_s24 + $0x58] sm:$0xff] }
  0x13   : > { %398 = vmatmul.msk.f32.vlgmr.msra.gmra.mxu0 %vm197_vm1, %v174_v5  ;;  %402 = vmatmul.msk.f32.vlgmr.msra.gmra.mxu1 %vm197_vm1, %v178_v6  ;;  %v189_v16 = vld [vmem:[%s166_s24 + $0x78] sm:$0xff] }
  0x14   : > { %v177_v17 = vld [vmem:[%s166_s24 + $0x18] sm:$0xff] }
  0x15   : > { %v181_v18 = vld [vmem:[%s166_s24 + $0x38] sm:$0xff] }
  0x1a   : > { %407 = vmatmul.msk.f32.gmra.mxu2 %vm197_vm1, %v183_v7  ;;  %411 = vmatmul.msk.f32.gmra.mxu3 %vm197_vm1, %v187_v8 }
  0x1b   : > { %399 = vmatmul.msk.f32.gmra.mxu0 %vm197_vm1, %v175_v9  ;;  %403 = vmatmul.msk.f32.gmra.mxu1 %vm197_vm1, %v179_v10 }
  0x22   : > { %408 = vmatmul.msk.f32.gmra.mxu2 %vm197_vm1, %v184_v11  ;;  %412 = vmatmul.msk.f32.gmra.mxu3 %vm197_vm1, %v188_v12 }
  0x23   : > { %400 = vmatmul.msk.f32.gmra.mxu0 %vm197_vm1, %v176_v13  ;;  %404 = vmatmul.msk.f32.gmra.mxu1 %vm197_vm1, %v180_v14 }
  0x2a   : > { %409 = vmatmul.msk.f32.gmra.mxu2 %vm197_vm1, %v185_v15  ;;  %413 = vmatmul.msk.f32.gmra.mxu3 %vm197_vm1, %v189_v16 }
  0x2b   : > { %401 = vmatmul.msk.f32.gmra.mxu0 %vm197_vm1, %v177_v17  ;;  %405 = vmatmul.msk.f32.gmra.mxu1 %vm197_vm1, %v181_v18 }
  0x90   : > { %v267_v20 = vpop.f32.mrf.mxu0  ;;  %v279_v21 = vpop.f32.mrf.mxu1 }
  0x91   : > { %v268_v22 = vadd.f32 %v433_v19, %v267_v20  ;;  %v280_v23 = vadd.f32 %v433_v19, %v279_v21 }
  0x93   : > { %316 = vst.msk [vmem:[%s511_s29] sm:$0xff] %vm315_vm2, %v268_v22 }
  0x94   : > { %320 = vst.msk [vmem:[%s511_s29 + $0x20] sm:$0xff] %vm315_vm2, %v280_v23 }
  0x95   : > { %v291_v24 = vpop.f32.mrf.mxu2  ;;  %v303_v25 = vpop.f32.mrf.mxu3 }
  0x96   : > { %v292_v26 = vadd.f32 %v433_v19, %v291_v24  ;;  %v304_v27 = vadd.f32 %v433_v19, %v303_v25 }
  0x98   : > { %324 = vst.msk [vmem:[%s511_s29 + $0x40] sm:$0xff] %vm315_vm2, %v292_v26  ;;  %v270_v28 = vpop.f32.mrf.mxu0  ;;  %v282_v29 = vpop.f32.mrf.mxu1 }
  0x99   : > { %328 = vst.msk [vmem:[%s511_s29 + $0x60] sm:$0xff] %vm315_vm2, %v304_v27  ;;  %v271_v30 = vadd.f32 %v433_v19, %v270_v28  ;;  %v283_v31 = vadd.f32 %v433_v19, %v282_v29 }
  0x9b   : > { %317 = vst.msk [vmem:[%s511_s29 + $0x8] sm:$0xff] %vm315_vm2, %v271_v30 }
  0x9c   : > { %321 = vst.msk [vmem:[%s511_s29 + $0x28] sm:$0xff] %vm315_vm2, %v283_v31 }
  0x9d   : > { %v294_v32 = vpop.f32.mrf.mxu2  ;;  %v306_v33 = vpop.f32.mrf.mxu3 }
  0x9e   : > { %v295_v34 = vadd.f32 %v433_v19, %v294_v32  ;;  %v307_v35 = vadd.f32 %v433_v19, %v306_v33 }
  0xa0   : > { %325 = vst.msk [vmem:[%s511_s29 + $0x48] sm:$0xff] %vm315_vm2, %v295_v34  ;;  %v273_v36 = vpop.f32.mrf.mxu0  ;;  %v285_v37 = vpop.f32.mrf.mxu1 }
  0xa1   : > { %329 = vst.msk [vmem:[%s511_s29 + $0x68] sm:$0xff] %vm315_vm2, %v307_v35  ;;  %v274_v38 = vadd.f32 %v433_v19, %v273_v36  ;;  %v286_v39 = vadd.f32 %v433_v19, %v285_v37 }
  0xa3   : > { %318 = vst.msk [vmem:[%s511_s29 + $0x10] sm:$0xff] %vm315_vm2, %v274_v38 }
  0xa4   : > { %322 = vst.msk [vmem:[%s511_s29 + $0x30] sm:$0xff] %vm315_vm2, %v286_v39 }
  0xa5   : > { %v297_v40 = vpop.f32.mrf.mxu2  ;;  %v309_v41 = vpop.f32.mrf.mxu3 }
  0xa6   : > { %v298_v42 = vadd.f32 %v433_v19, %v297_v40  ;;  %v310_v43 = vadd.f32 %v433_v19, %v309_v41 }
  0xa8   : > { %326 = vst.msk [vmem:[%s511_s29 + $0x50] sm:$0xff] %vm315_vm2, %v298_v42  ;;  %v276_v44 = vpop.f32.mrf.mxu0  ;;  %v288_v45 = vpop.f32.mrf.mxu1 }
  0xa9   : > { %330 = vst.msk [vmem:[%s511_s29 + $0x70] sm:$0xff] %vm315_vm2, %v310_v43  ;;  %v277_v46 = vadd.f32 %v433_v19, %v276_v44  ;;  %v289_v47 = vadd.f32 %v433_v19, %v288_v45 }
  0xab   : > { %319 = vst.msk [vmem:[%s511_s29 + $0x18] sm:$0xff] %vm315_vm2, %v277_v46 }
  0xac   : > { %323 = vst.msk [vmem:[%s511_s29 + $0x38] sm:$0xff] %vm315_vm2, %v289_v47 }
  0xad   : > { %v300_v48 = vpop.f32.mrf.mxu2  ;;  %v312_v49 = vpop.f32.mrf.mxu3 }
  0xae   : > { %v301_v50 = vadd.f32 %v433_v19, %v300_v48  ;;  %v313_v51 = vadd.f32 %v433_v19, %v312_v49 }
  0xb0   : > { %327 = vst.msk [vmem:[%s511_s29 + $0x58] sm:$0xff] %vm315_vm2, %v301_v50 }
  0xb1   : > { %331 = vst.msk [vmem:[%s511_s29 + $0x78] sm:$0xff] %vm315_vm2, %v313_v51 }
  0xb2 PF: > { %s13_s12 = sadd.s32 1, %s440_s12  }
  0xb3   : > { %p10_p4 = scmp.ge.s32.totalorder %s13_s12, 4  }
  0xb5   :  { %12 = sbr.rel (!%p10_p4) target bundleno = 1 (0x1), region = 62 }

</bundles_post_ra>
